<compile_context>
chip_gen: v7x
topology: tpu7x:2x2x1
jax: 0.10.0
libtpu: 0.0.40
codegen_flags: <defaults>
</compile_context>

<pallas_src>
import functools

import jax
import jax.numpy as jnp
from jax.experimental import pallas as pl
from jax.experimental.pallas import tpu as pltpu


# ------------------------------ fused kernel -------------------------------

def _fused_ln_kernel(x_ref, ms_ref, w_ref, b_ref, o_ref, *,
                     block_meta, eps, normalization, affine):
    """One column-tile of the fused equivariant LayerNorm (feature-major).

    x_ref : (dim, T)  input tile  -- features on sublanes, rows on lanes
    ms_ref: (dim, 1)  per-element mean shift          (VMEM-resident)
    w_ref : (dim, 1)  per-element affine weight       (VMEM-resident)
    b_ref : (dim, 1)  per-element bias (zeros outside scalar blocks)
    o_ref : (dim, T)  output tile
    block_meta: static tuple of (row_offset, mul, d, is_scalar, center).
    """
    x = x_ref[...].astype(jnp.float32)          # f32 accumulation
    msv = ms_ref[...]
    wv = w_ref[...]
    bv = b_ref[...]

    outs = []
    for (off, mul, d, is_scalar, center) in block_meta:
        nrows = mul * d
        xb = x[off:off + nrows, :]                               # (mul*d, T)

        if center:
            # Mean over the `mul` axis per spherical component c; row
            # (m*d + c) of the block is multiplicity m, component c.
            if d == 1:
                mean = jnp.mean(xb, axis=0, keepdims=True)       # (1, T)
                xb = xb - mean * msv[off:off + nrows, :]         # lane-dense
            else:
                acc = xb[0:d, :]
                for m in range(1, mul):                          # static unroll
                    acc = acc + xb[m * d:(m + 1) * d, :]
                mean = acc * (1.0 / mul)                         # (d, T)
                # Subtract per multiplicity slice; no [mean]*mul concatenate.
                pieces = [
                    xb[m * d:(m + 1) * d, :]
                    - mean * msv[off + m * d:off + (m + 1) * d, :]
                    for m in range(mul)
                ]
                xb = pieces[0] if mul == 1 else jnp.concatenate(pieces, axis=0)

        scale = (1.0 / mul) if normalization == "norm" else (1.0 / (mul * d))
        fnorm = jnp.sum(xb * xb, axis=0, keepdims=True) * scale  # (1, T)
        inv = jax.lax.rsqrt(fnorm + eps)                         # (1, T), EUP

        yb = xb * inv
        if affine:
            yb = yb * wv[off:off + nrows, :]
            if is_scalar:                                        # bias only for 0e
                yb = yb + bv[off:off + nrows, :]
        outs.append(yb)

    full = outs[0] if len(outs) == 1 else jnp.concatenate(outs, axis=0)
    o_ref[...] = full.astype(o_ref.dtype)        # one full-width lane-dense store


# ------------------------------ tile sizing --------------------------------

def _cdiv(a, b):
    return -(-a // b)


def _round_up(x, m):
    return ((x + m - 1) // m) * m


def _vmem_capacity_bytes():
    try:
        v = int(pltpu.get_tpu_info().vmem_capacity_bytes)
        if v > 0:
            return v
    except Exception:
        pass
    return 64 * 1024 * 1024          # conservative fallback (v7x per-TC VMEM)


def _choose_tile_cols(n_cols, dim, in_itemsize, out_itemsize, vmem_phys):
    """Column-tile size (== number of rows of the original (N, dim) input).

    Working set per column ~ dim * (2*in + 2*out + ~4 f32 temps) bytes
    (double-buffered input & output tiles plus the f32 working copies).
    Budget ~ 1/4 of physical VMEM -> multi-MiB tiles so the ~0.35us per-step
    overhead is amortized; keep >= ~4 tiles on large inputs so both v7x
    TensorCores get work and the pipeline has something to overlap.
    """
    budget = min(vmem_phys // 4, 32 * 1024 * 1024)
    per_col = max(1, dim * (2 * in_itemsize + 2 * out_itemsize + 4 * 4))
    t = budget // per_col
    t = min(t, _round_up(_cdiv(n_cols, 4), 128))
    if t >= n_cols:
        return n_cols                 # single full-extent block: always legal
    return max(128, (t // 128) * 128)


def _concrete_any_nonzero(vals):
    """True if `vals` has any nonzero entry; conservatively True if traced."""
    try:
        return bool(jnp.any(vals != 0))
    except Exception:
        return True


# --------------------------- module-like wrapper ----------------------------

class LayerNormPallas:
    """Pallas TPU port of the PyTorch LayerNorm (V3 + learnable mean shift).

    irreps: list of (mul, l, p) with p in {+1, -1}; scalars are (mul, 0, +1).
    """

    def __init__(self, irreps, eps=1e-5, affine=True, normalization="component"):
        assert normalization in ("norm", "component")
        self.irreps = [(int(m), int(l), int(p)) for (m, l, p) in irreps]
        self.eps = float(eps)
        self.affine = affine
        self.normalization = normalization

        num_scalar = sum(m for (m, l, p) in self.irreps if l == 0 and p == 1)
        num_features = sum(m for (m, _, _) in self.irreps)

        # Same parameter layout / init values as the PyTorch module __init__.
        parts = []
        for (m, l, p) in self.irreps:
            val = 1.0 if (l == 0 and p == 1) else 0.0
            parts.append(jnp.full((1, m, 1), val, dtype=jnp.float32))
        self.mean_shift = jnp.concatenate(parts, axis=1)       # (1, num_irreps, 1)

        if affine:
            self.affine_weight = jnp.ones((num_features,), dtype=jnp.float32)
            self.affine_bias = jnp.zeros((num_scalar,), dtype=jnp.float32)
        else:
            self.affine_weight = None
            self.affine_bias = None

    @property
    def dim(self):
        return sum(m * (2 * l + 1) for (m, l, _) in self.irreps)

    # ---- per-element (dim, 1) parameters + static per-block metadata ----

    def _params_and_meta(self):
        dim = self.dim
        ms_parts, w_parts, b_parts, meta = [], [], [], []
        off = iw = ib = ims = 0
        for (mul, l, p) in self.irreps:
            d = 2 * l + 1
            ms_blk = self.mean_shift[0, ims:ims + mul, 0]              # (mul,)
            ims += mul
            ms_parts.append(jnp.repeat(ms_blk.astype(jnp.float32), d))

            if self.affine:
                w_blk = self.affine_weight[iw:iw + mul]
                iw += mul
                w_parts.append(jnp.repeat(w_blk.astype(jnp.float32), d))
            else:
                w_parts.append(jnp.ones((mul * d,), dtype=jnp.float32))

            is_scalar = (d == 1 and p == 1)
            if self.affine and is_scalar:
                b_parts.append(self.affine_bias[ib:ib + mul].astype(jnp.float32))
                ib += mul
            else:
                b_parts.append(jnp.zeros((mul * d,), dtype=jnp.float32))

            center = _concrete_any_nonzero(ms_blk)   # skip centering if shift==0
            meta.append((off, mul, d, is_scalar, center))
            off += mul * d
        assert off == dim
        ms = jnp.concatenate(ms_parts).reshape(dim, 1)
        w = jnp.concatenate(w_parts).reshape(dim, 1)
        b = jnp.concatenate(b_parts).reshape(dim, 1)
        return ms, w, b, tuple(meta)

    def __call__(self, node_input, *, tile_cols=None, feature_major=False):
        x = jnp.asarray(node_input)
        if feature_major:
            x_fm = x                    # already (dim, N): no layout plumbing
        else:
            x_fm = x.T                  # (N, dim) -> (dim, N): rows on lanes
        dim, n_cols = x_fm.shape
        assert dim == self.dim

        ms, w, b, meta = self._params_and_meta()

        in_item = jnp.dtype(x_fm.dtype).itemsize
        out_item = in_item
        vmem_phys = _vmem_capacity_bytes()
        if tile_cols is None:
            tile_cols = _choose_tile_cols(n_cols, dim, in_item, out_item, vmem_phys)
        elif tile_cols < n_cols:
            assert tile_cols % 128 == 0, "tile_cols must be a multiple of 128"
        tile_cols = min(int(tile_cols), n_cols)
        grid = (pl.cdiv(n_cols, tile_cols),)

        kern = functools.partial(
            _fused_ln_kernel, block_meta=meta, eps=self.eps,
            normalization=self.normalization, affine=self.affine)

        cost = pl.CostEstimate(
            flops=int(8 * n_cols * dim),
            transcendentals=int(n_cols * len(meta)),
            bytes_accessed=int(2 * n_cols * dim * in_item + 3 * dim * 4),
        )

        out_fm = pl.pallas_call(
            kern,
            out_shape=jax.ShapeDtypeStruct((dim, n_cols), x_fm.dtype),
            grid_spec=pltpu.PrefetchScalarGridSpec(
                num_scalar_prefetch=0,
                grid=grid,
                in_specs=[
                    pl.BlockSpec((dim, tile_cols), lambda i: (0, i)),  # x tile
                    pl.BlockSpec((dim, 1), lambda i: (0, 0)),          # mean_shift
                    pl.BlockSpec((dim, 1), lambda i: (0, 0)),          # weight
                    pl.BlockSpec((dim, 1), lambda i: (0, 0)),          # bias
                ],
                out_specs=pl.BlockSpec((dim, tile_cols), lambda i: (0, i)),
            ),
            compiler_params=pltpu.CompilerParams(
                dimension_semantics=("parallel",),
                vmem_limit_bytes=int(min(vmem_phys // 2, 64 * 1024 * 1024)),
            ),
            cost_estimate=cost,
        )(x_fm, ms, w, b)

        return out_fm if feature_major else out_fm.T


# ------------------------- pure-JAX reference check -------------------------

def layernorm_ref(node_input, module: LayerNormPallas):
    """Direct transcription of the PyTorch forward in plain jnp (for checking)."""
    N, dim = node_input.shape
    fields = []
    ix = iw = ib = ims = 0
    for (mul, l, p) in module.irreps:
        d = 2 * l + 1
        field = node_input[:, ix:ix + mul * d].reshape(N, mul, d)
        ix += mul * d
        field_mean = jnp.mean(field, axis=1, keepdims=True)
        mean_shift = module.mean_shift[:, ims:ims + mul, :]
        field = field - field_mean * mean_shift
        ims += mul
        if module.normalization == "norm":
            field_norm = jnp.sum(field ** 2, axis=-1)
        else:
            field_norm = jnp.mean(field ** 2, axis=-1)
        field_norm = jnp.mean(field_norm, axis=1, keepdims=True)
        field_norm = (field_norm + module.eps) ** -0.5
        if module.affine:
            weight = module.affine_weight[None, iw:iw + mul]
            iw += mul
            field_norm = field_norm * weight
        field = field * field_norm.reshape(N, -1, 1)
        if module.affine and d == 1 and p == 1:
            bias = module.affine_bias[ib:ib + mul]
            ib += mul
            field = field + bias.reshape(mul, 1)
        fields.append(field.reshape(N, mul * d))
    return jnp.concatenate(fields, axis=-1)


# ---------------------------------- main ------------------------------------

if __name__ == "__main__":
    # irreps "2x0e + 1x1o + 1x2e"  ->  dim = 2*1 + 1*3 + 1*5 = 10
    irreps = [(2, 0, +1), (1, 1, -1), (1, 2, +1)]
    key = jax.random.PRNGKey(0)
    k1, k2 = jax.random.split(key)

    # 1) main config: single fused call, default (auto) tiling
    ln = LayerNormPallas(irreps, eps=1e-5, affine=True, normalization="component")
    N = 64
    node_input = jax.random.normal(k1, (N, ln.dim), dtype=jnp.float32)
    out = jax.block_until_ready(ln(node_input))
    ref = layernorm_ref(node_input, ln)
    assert out.shape == (N, ln.dim)
    assert jnp.allclose(out, ref, atol=1e-5, rtol=1e-5), "mismatch (component)"

    # 2) multi-tile grid with a partial last column tile
    N2 = 300
    x2 = jax.random.normal(k2, (N2, ln.dim), dtype=jnp.float32)
    out2 = jax.block_until_ready(ln(x2, tile_cols=128))
    ref2 = layernorm_ref(x2, ln)
    assert jnp.allclose(out2, ref2, atol=1e-5, rtol=1e-5), "mismatch (tiled/partial)"

    # 3) native feature-major path (no wrapper transposes)
    out_fm = jax.block_until_ready(ln(x2.T, feature_major=True, tile_cols=128))
    assert jnp.allclose(out_fm, ref2.T, atol=1e-5, rtol=1e-5), "mismatch (feature-major)"

    # 4) 'norm' normalization branch
    ln_n = LayerNormPallas(irreps, eps=1e-5, affine=True, normalization="norm")
    out3 = jax.block_until_ready(ln_n(node_input))
    ref3 = layernorm_ref(node_input, ln_n)
    assert jnp.allclose(out3, ref3, atol=1e-5, rtol=1e-5), "mismatch (norm)"

    # 5) affine=False branch (static skip of weight/bias math)
    ln_na = LayerNormPallas(irreps, eps=1e-5, affine=False, normalization="component")
    out4 = jax.block_until_ready(ln_na(node_input))
    ref4 = layernorm_ref(node_input, ln_na)
    assert jnp.allclose(out4, ref4, atol=1e-5, rtol=1e-5), "mismatch (no affine)"

    print("KERNEL_OK")
</pallas_src>

<mosaic_0001>
module attributes {stable_mosaic.version = 11 : i64} {
  func.func @_fused_ln_kernel(%arg0: i32, %arg1: memref<10x64xf32, #tpu.memory_space<vmem>>, %arg2: memref<10x1xf32, #tpu.memory_space<vmem>>, %arg3: memref<10x1xf32, #tpu.memory_space<vmem>>, %arg4: memref<10x1xf32, #tpu.memory_space<vmem>>, %arg5: memref<10x64xf32, #tpu.memory_space<vmem>>) attributes {dimension_semantics = [#tpu.dimension_semantics<parallel>], iteration_bounds = array<i64: 1>, scalar_prefetch = 0 : i64, scratch_operands = 0 : i64, tpu.core_type = #tpu.core_type<tc>, window_params = [{transform_indices = @transform_0, window_bounds = array<i64: 10, 64>}, {pipeline_mode = #tpu.pipeline_mode<synchronous>, transform_indices = @transform_1, window_bounds = array<i64: 10, 1>}, {pipeline_mode = #tpu.pipeline_mode<synchronous>, transform_indices = @transform_2, window_bounds = array<i64: 10, 1>}, {pipeline_mode = #tpu.pipeline_mode<synchronous>, transform_indices = @transform_3, window_bounds = array<i64: 10, 1>}, {transform_indices = @transform_4, window_bounds = array<i64: 10, 64>}]} {
    %c0 = arith.constant 0 : index
    %c0_0 = arith.constant 0 : index
    %0 = vector.load %arg1[%c0, %c0_0] : memref<10x64xf32, #tpu.memory_space<vmem>>, vector<10x64xf32>
    %c0_1 = arith.constant 0 : index
    %c0_2 = arith.constant 0 : index
    %1 = vector.load %arg2[%c0_1, %c0_2] : memref<10x1xf32, #tpu.memory_space<vmem>>, vector<10x1xf32>
    %c0_3 = arith.constant 0 : index
    %c0_4 = arith.constant 0 : index
    %2 = vector.load %arg3[%c0_3, %c0_4] : memref<10x1xf32, #tpu.memory_space<vmem>>, vector<10x1xf32>
    %c0_5 = arith.constant 0 : index
    %c0_6 = arith.constant 0 : index
    %3 = vector.load %arg4[%c0_5, %c0_6] : memref<10x1xf32, #tpu.memory_space<vmem>>, vector<10x1xf32>
    %4 = vector.extract_strided_slice %0 {offsets = [0, 0], sizes = [2, 64], strides = [1, 1]} : vector<10x64xf32> to vector<2x64xf32>
    %cst = arith.constant dense<0.000000e+00> : vector<64xf32>
    %5 = vector.multi_reduction <add>, %4, %cst [0] : vector<2x64xf32> to vector<64xf32>
    %6 = vector.shape_cast %5 : vector<64xf32> to vector<1x64xf32>
    %cst_7 = arith.constant 2.000000e+00 : f32
    %7 = vector.broadcast %cst_7 : f32 to vector<1x64xf32>
    %8 = arith.divf %6, %7 : vector<1x64xf32>
    %9 = vector.extract_strided_slice %1 {offsets = [0, 0], sizes = [2, 1], strides = [1, 1]} : vector<10x1xf32> to vector<2x1xf32>
    %10 = vector.broadcast %8 : vector<1x64xf32> to vector<2x64xf32>
    %11 = vector.broadcast %9 : vector<2x1xf32> to vector<2x64xf32>
    %12 = arith.mulf %10, %11 : vector<2x64xf32>
    %13 = arith.subf %4, %12 : vector<2x64xf32>
    %14 = arith.mulf %13, %13 : vector<2x64xf32>
    %cst_8 = arith.constant dense<0.000000e+00> : vector<64xf32>
    %15 = vector.multi_reduction <add>, %14, %cst_8 [0] : vector<2x64xf32> to vector<64xf32>
    %16 = vector.shape_cast %15 : vector<64xf32> to vector<1x64xf32>
    %cst_9 = arith.constant 5.000000e-01 : f32
    %17 = vector.broadcast %cst_9 : f32 to vector<1x64xf32>
    %18 = arith.mulf %16, %17 : vector<1x64xf32>
    %cst_10 = arith.constant 9.99999974E-6 : f32
    %19 = vector.broadcast %cst_10 : f32 to vector<1x64xf32>
    %20 = arith.addf %18, %19 : vector<1x64xf32>
    %21 = math.rsqrt %20 : vector<1x64xf32>
    %22 = vector.broadcast %21 : vector<1x64xf32> to vector<2x64xf32>
    %23 = arith.mulf %13, %22 : vector<2x64xf32>
    %24 = vector.extract_strided_slice %2 {offsets = [0, 0], sizes = [2, 1], strides = [1, 1]} : vector<10x1xf32> to vector<2x1xf32>
    %25 = vector.broadcast %24 : vector<2x1xf32> to vector<2x64xf32>
    %26 = arith.mulf %23, %25 : vector<2x64xf32>
    %27 = vector.extract_strided_slice %3 {offsets = [0, 0], sizes = [2, 1], strides = [1, 1]} : vector<10x1xf32> to vector<2x1xf32>
    %28 = vector.broadcast %27 : vector<2x1xf32> to vector<2x64xf32>
    %29 = arith.addf %26, %28 : vector<2x64xf32>
    %30 = vector.extract_strided_slice %0 {offsets = [2, 0], sizes = [3, 64], strides = [1, 1]} : vector<10x64xf32> to vector<3x64xf32>
    %31 = arith.mulf %30, %30 : vector<3x64xf32>
    %cst_11 = arith.constant dense<0.000000e+00> : vector<64xf32>
    %32 = vector.multi_reduction <add>, %31, %cst_11 [0] : vector<3x64xf32> to vector<64xf32>
    %33 = vector.shape_cast %32 : vector<64xf32> to vector<1x64xf32>
    %cst_12 = arith.constant 0.333333343 : f32
    %34 = vector.broadcast %cst_12 : f32 to vector<1x64xf32>
    %35 = arith.mulf %33, %34 : vector<1x64xf32>
    %cst_13 = arith.constant 9.99999974E-6 : f32
    %36 = vector.broadcast %cst_13 : f32 to vector<1x64xf32>
    %37 = arith.addf %35, %36 : vector<1x64xf32>
    %38 = math.rsqrt %37 : vector<1x64xf32>
    %39 = vector.broadcast %38 : vector<1x64xf32> to vector<3x64xf32>
    %40 = arith.mulf %30, %39 : vector<3x64xf32>
    %41 = vector.extract_strided_slice %2 {offsets = [2, 0], sizes = [3, 1], strides = [1, 1]} : vector<10x1xf32> to vector<3x1xf32>
    %42 = vector.broadcast %41 : vector<3x1xf32> to vector<3x64xf32>
    %43 = arith.mulf %40, %42 : vector<3x64xf32>
    %44 = vector.extract_strided_slice %0 {offsets = [5, 0], sizes = [5, 64], strides = [1, 1]} : vector<10x64xf32> to vector<5x64xf32>
    %45 = arith.mulf %44, %44 : vector<5x64xf32>
    %cst_14 = arith.constant dense<0.000000e+00> : vector<64xf32>
    %46 = vector.multi_reduction <add>, %45, %cst_14 [0] : vector<5x64xf32> to vector<64xf32>
    %47 = vector.shape_cast %46 : vector<64xf32> to vector<1x64xf32>
    %cst_15 = arith.constant 2.000000e-01 : f32
    %48 = vector.broadcast %cst_15 : f32 to vector<1x64xf32>
    %49 = arith.mulf %47, %48 : vector<1x64xf32>
    %cst_16 = arith.constant 9.99999974E-6 : f32
    %50 = vector.broadcast %cst_16 : f32 to vector<1x64xf32>
    %51 = arith.addf %49, %50 : vector<1x64xf32>
    %52 = math.rsqrt %51 : vector<1x64xf32>
    %53 = vector.broadcast %52 : vector<1x64xf32> to vector<5x64xf32>
    %54 = arith.mulf %44, %53 : vector<5x64xf32>
    %55 = vector.extract_strided_slice %2 {offsets = [5, 0], sizes = [5, 1], strides = [1, 1]} : vector<10x1xf32> to vector<5x1xf32>
    %56 = vector.broadcast %55 : vector<5x1xf32> to vector<5x64xf32>
    %57 = arith.mulf %54, %56 : vector<5x64xf32>
    %58 = tpu.concatenate %29, %43, %57 in 0 : vector<2x64xf32>, vector<3x64xf32>, vector<5x64xf32> -> vector<10x64xf32>
    %c0_17 = arith.constant 0 : index
    %c0_18 = arith.constant 0 : index
    %59 = vector.load %arg5[%c0_17, %c0_18] : memref<10x64xf32, #tpu.memory_space<vmem>>, vector<10x64xf32>
    tpu.vector_store %arg5[%c0_17, %c0_18], %58 {strides = array<i32>} : memref<10x64xf32, #tpu.memory_space<vmem>>, vector<10x64xf32>,
    return
  }
  func.func @transform_0(%arg0: i32) -> (i32, i32) {
    %c0_i32 = arith.constant 0 : i32
    %c0_i32_0 = arith.constant 0 : i32
    return %c0_i32, %arg0 : i32, i32
  }
  func.func @transform_1(%arg0: i32) -> (i32, i32) {
    %c0_i32 = arith.constant 0 : i32
    %c0_i32_0 = arith.constant 0 : i32
    %c0_i32_1 = arith.constant 0 : i32
    return %c0_i32, %c0_i32_0 : i32, i32
  }
  func.func @transform_2(%arg0: i32) -> (i32, i32) {
    %c0_i32 = arith.constant 0 : i32
    %c0_i32_0 = arith.constant 0 : i32
    %c0_i32_1 = arith.constant 0 : i32
    return %c0_i32, %c0_i32_0 : i32, i32
  }
  func.func @transform_3(%arg0: i32) -> (i32, i32) {
    %c0_i32 = arith.constant 0 : i32
    %c0_i32_0 = arith.constant 0 : i32
    %c0_i32_1 = arith.constant 0 : i32
    return %c0_i32, %c0_i32_0 : i32, i32
  }
  func.func @transform_4(%arg0: i32) -> (i32, i32) {
    %c0_i32 = arith.constant 0 : i32
    %c0_i32_0 = arith.constant 0 : i32
    return %c0_i32, %arg0 : i32, i32
  }
}

</mosaic_0001>

<bundles_post_ra>
// kernel: tpu_custom_call.1
= control target key start
LH: loop header
LB: loop body
LE: loop exit
PB: predicated region body
PF: predicated region fallthrough
CT: control target
= control target key end

     0   :  { %v168_v2 = vmov 0   ;;  %s238_s0 = inlined_call_operand.vmem [shape: f32[10,64], index: 0, kind: input, shape index: {}]   ;;  %s239_s1 = inlined_call_operand.vmem [shape: f32[10,1], index: 1, kind: input, shape index: {}]   ;;  %s240_s2 = inlined_call_operand.vmem [shape: f32[10,1], index: 2, kind: input, shape index: {}]   ;;  %s241_s3 = inlined_call_operand.vmem [shape: f32[10,1], index: 3, kind: input, shape index: {}]   ;;  %s242_s4 = inlined_call_operand.hbm [shape: f32[10,64], index: 4, kind: output, shape index: {}]  }
   0x1   :  { %v20_v0 = vld [vmem:[%s239_s1] sm:$0xff]  ;;  %136 = vset.pattern.permute.xlu0 %v168_v2  ;;  %137 = vset.pattern.permute.xlu1 %v168_v2 }
   0x2   :  { %v23_v1 = vld [vmem:[%s241_s3] sm:$0xff]  ;;  %36 = vperm.xlu0 %136, %v20_v0  }
   0x3   :  { %61 = vperm.xlu1 %137, %v23_v1  }
   0x4   :  { %9 = vsyncpa [#allocation3], 0  ;;  %v21_v3 = vld [vmem:[%s240_s2] sm:$0xff]  ;;  %v22_v4 = vld [vmem:[%s240_s2 + $0x8] sm:$0x3]  ;;  %vm84_vm0 = vcmask 1042432  }
   0x5   :  { %v212_v5 = vld [vmem:[%s238_s0] sm:$0xff]  ;;  %v19_v6 = vld [vmem:[%s238_s0 + $0x8] sm:$0x3]  ;;  %vm89_vm1 = vcmask 520192   ;;  %vm24_vm2 = vcmask 517120   ;;  %vm69_vm3 = vcmask 518144  }
   0x6   :  { %55 = vperm.xlu0 %136, %v21_v3   ;;  %v65_v7 = vmul.f32 %v212_v5, %v212_v5  ;;  %v82_v8 = vmul.f32 %v19_v6, %v19_v6  ;;  %v25_v16 = vsel %vm24_vm2, %v212_v5, 0.0  ;;  %s169_s0 = smov [#allocation2]   ;;  %vm109_vm4 = vcmask 1041408  }
   0x7   :  { %104 = vperm.xlu1 %137, %v22_v4   ;;  %v26_v18 = vrot.slane %v25_v16, 4  ;;  %s121_s2 = sshll.u32 %s169_s0, 4  ;;  %vm111_vm5 = vcmask 1044480   ;;  %vm113_vm6 = vcmask 523264   ;;  %s122_s2 = int_to_ptr.vmem [resolvable:$true] %s121_s2 }
   0x8   :  { %v85_v9 = vrot.slane %v65_v7, 5  ;;  %v86_v10 = vrot.slane %v82_v8, 5  ;;  %v67_v24 = vrot.slane %v65_v7, 2  ;;  %s144_s25 = scalar_lea.vmem %s122_s2, 256  ;;  %p149_p1 = scmp.lt.s32.totalorder %s122_s2, %s122_s2 }
   0x9   :  { %v27_v20 = vadd.f32 %v26_v18, %v25_v16  ;;  %p145_p0 = scmp.ne.s32.totalorder %s122_s2, %s144_s25  ;;  %p150_p2 = scmp.lt.s32.totalorder %s144_s25, %s144_s25 }
   0xa   :  { %v87_v11 = vsel %vm84_vm0, %v85_v9, %v86_v10  ;;  %v70_v27 = vsel %vm69_vm3, %v67_v24, 0.0 }
   0xb   :  { %v90_v12 = vsel %vm89_vm1, %v87_v11, 0.0  ;;  %v28_v22 = vrot.slane %v27_v20, 2  ;;  %v71_v29 = vrot.slane %v70_v27, 4  ;;  %p151_p3 = por %p150_p2, %p149_p1 }
   0xc   :  { %v91_v13 = vrot.slane %v90_v12, 4 }
   0xd   :  { %v29_v25 = vadd.f32 %v28_v22, %v27_v20  ;;  %v72_v31 = vadd.f32 %v71_v29, %v70_v27  ;;  %p152_p4 = pnand %p151_p3, %p145_p0 }
   0xe   :  { %v92_v14 = vadd.f32 %v91_v13, %v90_v12 }
   0xf   :  { %v30_v28 = vrot.slane %v29_v25, 1  ;;  %v73_v33 = vrot.slane %v72_v31, 2 }
  0x10   :  { %v93_v15 = vrot.slane %v92_v14, 2 }
  0x11   :  { %v31_v30 = vadd.f32 %v30_v28, %v29_v25  ;;  %v74_v39 = vadd.f32 %v73_v33, %v72_v31 }
  0x12   :  { %v94_v17 = vadd.f32 %v93_v15, %v92_v14 }
  0x13   :  { %v33_v32 = vmul.f32 0.5, %v31_v30  ;;  %v75_v44 = vrot.slane %v74_v39, 1 }
  0x14   :  { %v95_v19 = vrot.slane %v94_v17, 1 }
  0x15   :  { %v76_v48 = vadd.f32 %v75_v44, %v74_v39 }
  0x16   :  { %v96_v21 = vadd.f32 %v95_v19, %v94_v17 }
  0x17   :  { %v77_v51 = vmul.f32 0.33333334, %v76_v48 }
  0x18   :  { %v97_v23 = vmul.f32 0.2, %v96_v21 }
  0x19   :  { %v78_v54 = vadd.f32 1e-05, %v77_v51 }
  0x1a   :  { %v98_v26 = vadd.f32 1e-05, %v97_v23 }
  0x1c   :  { %138 = vrsqrt.f32 %v98_v26 }
  0x1d   :  { %140 = vrsqrt.f32 %v78_v54 }
  0x26   :  { %v139_v34 = vpop.eup %138 }
  0x27   :  { %v101_v38 = vmul.f32 %v139_v34, %v19_v6  ;;  %v141_v57 = vpop.eup %140  ;;  %v100_v62 = vmul.f32 %v139_v34, %v212_v5 }
  0x28   :  { %v80_v60 = vmul.f32 %v141_v57, %v212_v5 }
  0x81   :  { %v37_v35 = vpop.permute.xlu0 %36 }
  0x82   :  { %v62_v36 = vpop.permute.xlu1 %61  ;;  %v39_v37 = vmul.f32 %v37_v35, %v33_v32 }
  0x84   :  { %v40_v40 = vsub.f32 %v212_v5, %v39_v37 }
  0x85   :  { %v56_v61 = vpop.permute.xlu0 %55 }
  0x86   :  { %v105_v41 = vpop.permute.xlu1 %104  ;;  %v41_v42 = vmul.f32 %v40_v40, %v40_v40  ;;  %v81_v0 = vmul.f32 %v80_v60, %v56_v61  ;;  %v107_v2 = vmul.f32 %v100_v62, %v56_v61 }
  0x87   :  { %v108_v43 = vmul.f32 %v105_v41, %v101_v38 }
  0x88   :  { %v42_v45 = vsel %vm24_vm2, %v41_v42, 0.0 }
  0x89   :  { %115 = vst.msk [vmem:[#allocation2 + $0x8] sm:$0x3] %vm24_vm2, %v108_v43  ;;  %v43_v46 = vrot.slane %v42_v45, 4 }
  0x8b   :  { %v44_v47 = vadd.f32 %v43_v46, %v42_v45 }
  0x8d   :  { %v45_v49 = vrot.slane %v44_v47, 2 }
  0x8f   :  { %v46_v50 = vadd.f32 %v45_v49, %v44_v47 }
  0x91   :  { %v47_v52 = vrot.slane %v46_v50, 1 }
  0x93   :  { %v48_v53 = vadd.f32 %v47_v52, %v46_v50 }
  0x95   :  { %v49_v55 = vmul.f32 0.5, %v48_v53 }
  0x97   :  { %v50_v56 = vadd.f32 1e-05, %v49_v55 }
  0x99   :  { %142 = vrsqrt.f32 %v50_v56 }
  0xa3   :  { %v143_v58 = vpop.eup %142 }
  0xa4   :  { %v52_v59 = vmul.f32 %v143_v58, %v40_v40 }
  0xa6   :  { %v58_v63 = vmul.f32 %v56_v61, %v52_v59 }
  0xa8   :  { %v64_v1 = vadd.f32 %v62_v36, %v58_v63 }
  0xaa   :  { %v110_v3 = vsel %vm109_vm4, %v64_v1, %v81_v0 }
  0xab   :  { %v112_v4 = vsel %vm111_vm5, %v110_v3, %v107_v2 }
  0xac   :  { %114 = vst.msk [vmem:[#allocation2] sm:$0xff] %vm113_vm6, %v112_v4 }
  0xad   :  { %155 = shalt.err (!%p152_p4)
}
  0xae   :  { %s156_s28 = scalar_lea.hbm %s242_s4, 256 }
  0xaf   :  { %p157_p5 = scmp.ne.s32.totalorder %s242_s4, %s156_s28  ;;  %p160_p6 = scmp.lt.u32.totalorder %s156_s28, %s242_s4 }
  0xb1   :  { %p162_p7 = pnand %p160_p6, %p157_p5 }
  0xb3   :  { %165 = shalt.err (!%p162_p7)
}
  0xb4   :  { %s170_s7 = smov 128   ;;  %s171_s8 = smov 8  }
  0xb5   :  { %127 = dma.vmem_to_hbm [thread:$0]  %s122_s2, 256, %s242_s4, [#allocation3], %s170_s7, %s170_s7, %s171_s8  }
  0xb6   :  { %166 = dma.done.wait [#allocation3], 256  }
  0xb7   :  { %167 = vsyncadd [#allocation3], 4294967040 }
  0xb8   :  { %131 = vsyncpa [#allocation3], 1 }

</bundles_post_ra>
